<compile_context>
chip_gen: v5e
topology: v5e:2x2
jax: 0.10.0
libtpu: 0.0.40
codegen_flags: <defaults>
</compile_context>

<pallas_src>
import math

import jax
import jax.numpy as jnp
from jax import lax
from jax.experimental import pallas as pl
from jax.experimental.pallas import tpu as pltpu


def _make_dilated_conv_kernel(TB, Hp, Ho, K, NN, KH, dh):
    """Kernel for one frame tile: (TB, Hp, K=Wp*Cin) -> (TB, Ho, NN=Wo*Cout)."""
    M = TB * Ho

    def kernel(x_ref, w_ref, b_ref, o_ref, acc_ref):
        # x_ref  : (TB, Hp, K)   zero-padded frames, (W, Cin) folded onto lanes
        # w_ref  : (KH, K, NN)   banded weight slabs (one per kh row tap)
        # b_ref  : (1, NN)       bias tiled across Wo
        # o_ref  : (TB, Ho, NN)  lane-dense output
        # acc_ref: (M, NN) f32   VMEM accumulator
        def tap(kh):
            # Contiguous row window for this kh tap; the kw taps and the W axis
            # are already folded into the banded weight's contraction dim.
            rows = x_ref[:, pl.ds(kh * dh, Ho), :]               # (TB, Ho, K)
            return jnp.dot(rows.reshape(M, K), w_ref[kh],
                           preferred_element_type=jnp.float32)

        acc_ref[...] = tap(0)
        for kh in range(1, KH):                                  # KH == 3, static
            acc_ref[...] += tap(kh)

        out = jnp.maximum(acc_ref[...] + b_ref[...], 0.0)        # bias + ReLU
        o_ref[...] = out.reshape(TB, Ho, NN).astype(o_ref.dtype)

    return kernel


def _banded_weight(w_hwio, Wp, Wo, dw):
    """(KH, KW, Cin, Cout) -> (KH, Wp*Cin, Wo*Cout) banded slab.

    wb[kh, wi*Cin + ci, wo*Cout + co] = w[kh, kw, ci, co] if wi == wo + kw*dw,
    else 0.  One fat matmul against this slab == all kw taps of one kh row.
    """
    KH, KW, Cin, Cout = w_hwio.shape
    wi = jnp.arange(Wp)
    wo = jnp.arange(Wo)
    kw = jnp.arange(KW)
    sel = (wi[None, :, None] == wo[None, None, :] + kw[:, None, None] * dw)
    sel = sel.astype(w_hwio.dtype)                        # (KW, Wp, Wo)
    wb = jnp.einsum('kab,hkio->haibo', sel, w_hwio)       # (KH, Wp, Cin, Wo, Cout)
    return wb.reshape(KH, Wp * Cin, Wo * Cout)


def _pick_frame_tile(F, max_tb=8):
    """Largest divisor of F that still leaves >= 2 grid steps (v7x: 2 TCs)."""
    target = min(max_tb, max(1, F // 2))
    for tb in range(target, 0, -1):
        if F % tb == 0:
            return tb
    return 1


def dilated_conv3x3_relu(x_fhwc, w_hwio, bias, *, dilation, padding):
    """One ConvBlock3d(kernel=(1,3,3), stride=1, groups=1, 'zeros') + ReLU
    on frame-major channels-last input (F=N*D, H, W, Cin)."""
    F, H, W, Cin = x_fhwc.shape
    KH, KW, Cin_w, Cout = w_hwio.shape
    assert Cin == Cin_w               # TODO(synk): groups != 1 not supported
    dh, dw = dilation
    ph, pw = padding

    Hp, Wp = H + 2 * ph, W + 2 * pw
    Ho, Wo = Hp - dh * (KH - 1), Wp - dw * (KW - 1)       # stride 1
    K, NN = Wp * Cin, Wo * Cout

    # 'zeros' padding + (W, Cin) -> lane folding done as plain-JAX glue.
    xp = jnp.pad(x_fhwc, ((0, 0), (ph, ph), (pw, pw), (0, 0))).reshape(F, Hp, K)
    wb = _banded_weight(w_hwio, Wp, Wo, dw)               # (KH, K, NN)
    brow = jnp.tile(bias, Wo).reshape(1, NN)              # (1, NN)

    TB = _pick_frame_tile(F)
    kernel = _make_dilated_conv_kernel(TB, Hp, Ho, K, NN, KH, dh)

    out = pl.pallas_call(
        kernel,
        out_shape=jax.ShapeDtypeStruct((F, Ho, NN), x_fhwc.dtype),
        grid_spec=pltpu.PrefetchScalarGridSpec(
            num_scalar_prefetch=0,
            grid=(F // TB,),
            in_specs=[
                pl.BlockSpec((TB, Hp, K), lambda f: (f, 0, 0)),
                pl.BlockSpec((KH, K, NN), lambda f: (0, 0, 0)),
                pl.BlockSpec((1, NN), lambda f: (0, 0)),
            ],
            out_specs=pl.BlockSpec((TB, Ho, NN), lambda f: (f, 0, 0)),
            scratch_shapes=[pltpu.VMEM((TB * Ho, NN), jnp.float32)],
        ),
        compiler_params=pltpu.CompilerParams(
            dimension_semantics=("parallel",),
            vmem_limit_bytes=32 * 1024 * 1024,
        ),
    )(xp, wb, brow)

    return out.reshape(F, Ho, Wo, Cout)


# (dilation == padding) along H/W for conv1, conv2, conv3 of the DilationBlock.
_DILATION_CFG = ((3, 3), (2, 2), (1, 1))


def dilation_block(x_ncdhw, params):
    """DilationBlock forward: conv1 -> conv2 -> conv3 (each 1x3x3 dilated conv
    + ReLU), PyTorch NCDHW convention at the boundary.

    x_ncdhw : (N, C, D, H, W)
    params  : [(weight (C, C, 1, 3, 3), bias (C,)) for conv1, conv2, conv3]
    """
    N, C, D, H, W = x_ncdhw.shape
    # One transpose into channels-last for the whole block (and one back).
    # TODO(synk): in production keep the whole model NDHWC and drop these.
    x = jnp.transpose(x_ncdhw, (0, 2, 3, 4, 1)).reshape(N * D, H, W, C)
    for (w_oidhw, b), d in zip(params, _DILATION_CFG):
        assert w_oidhw.shape[2] == 1          # 1x3x3 kernel: frames independent
        w_hwio = jnp.transpose(w_oidhw[:, :, 0], (2, 3, 1, 0))  # (KH,KW,Cin,Cout)
        x = dilated_conv3x3_relu(x, w_hwio, b, dilation=d, padding=d)
    F, Ho, Wo, Co = x.shape
    return jnp.transpose(x.reshape(N, D, Ho, Wo, Co), (0, 4, 1, 2, 3))


def _reference_dilation_block(x_ncdhw, params):
    """Pure-JAX reference (lax.conv_general_dilated + bias + ReLU), x3."""
    x = jnp.transpose(x_ncdhw, (0, 2, 3, 4, 1))
    for (w_oidhw, b), (dh, dw) in zip(params, _DILATION_CFG):
        w_dhwio = jnp.transpose(w_oidhw, (2, 3, 4, 1, 0))
        y = lax.conv_general_dilated(
            x, w_dhwio,
            window_strides=(1, 1, 1),
            padding=[(0, 0), (dh, dh), (dw, dw)],
            rhs_dilation=(1, dh, dw),
            dimension_numbers=("NDHWC", "DHWIO", "NDHWC"))
        x = jnp.maximum(y + b, 0.0)
    return jnp.transpose(x, (0, 4, 1, 2, 3))


if __name__ == "__main__":
    # DilationBlock(channels=8, activation=ReLU), small video-ish shapes.
    # Wo*Cout = 16*8 = 128 -> fully lane-dense output stores.
    N, C, D, H, W = 2, 8, 4, 16, 16

    key = jax.random.PRNGKey(0)
    kx, *pkeys = jax.random.split(key, 7)
    x = jax.random.normal(kx, (N, C, D, H, W), dtype=jnp.float32)

    # Deterministic Conv3d-style (kaiming-uniform-ish) init for the 3 convs.
    fan_in = C * 1 * 3 * 3
    bound = 1.0 / math.sqrt(fan_in)
    params = []
    for i in range(3):
        wk, bk = pkeys[2 * i], pkeys[2 * i + 1]
        wgt = jax.random.uniform(wk, (C, C, 1, 3, 3), minval=-bound,
                                 maxval=bound, dtype=jnp.float32)
        b = jax.random.uniform(bk, (C,), minval=-bound, maxval=bound,
                               dtype=jnp.float32)
        params.append((wgt, b))

    y = dilation_block(x, params)
    y = jax.block_until_ready(y)

    ref = _reference_dilation_block(x, params)
    assert y.shape == (N, C, D, H, W), y.shape
    max_err = float(jnp.max(jnp.abs(y - ref)))
    assert jnp.allclose(y, ref, atol=1e-4, rtol=1e-4), max_err

    print("KERNEL_OK")
</pallas_src>

<mosaic_0001>
module attributes {stable_mosaic.version = 11 : i64} {
  func.func @kernel(%arg0: i32, %arg1: memref<4x22x176xf32, #tpu.memory_space<vmem>>, %arg2: memref<3x176x128xf32, #tpu.memory_space<vmem>>, %arg3: memref<1x128xf32, #tpu.memory_space<vmem>>, %arg4: memref<4x16x128xf32, #tpu.memory_space<vmem>>, %arg5: memref<64x128xf32, #tpu.memory_space<vmem>>) attributes {dimension_semantics = [#tpu.dimension_semantics<parallel>], iteration_bounds = array<i64: 2>, scalar_prefetch = 0 : i64, scratch_operands = 1 : i64, tpu.core_type = #tpu.core_type<tc>, window_params = [{transform_indices = @transform_0, window_bounds = array<i64: 4, 22, 176>}, {pipeline_mode = #tpu.pipeline_mode<synchronous>, transform_indices = @transform_1, window_bounds = array<i64: 3, 176, 128>}, {pipeline_mode = #tpu.pipeline_mode<synchronous>, transform_indices = @transform_2, window_bounds = array<i64: 1, 128>}, {transform_indices = @transform_3, window_bounds = array<i64: 4, 16, 128>}]} {
    %c0 = arith.constant 0 : index
    %c0_0 = arith.constant 0 : index
    %c0_1 = arith.constant 0 : index
    %0 = vector.load %arg1[%c0, %c0_0, %c0_1] : memref<4x22x176xf32, #tpu.memory_space<vmem>>, vector<4x16x176xf32>
    %1 = vector.shape_cast %0 : vector<4x16x176xf32> to vector<64x176xf32>
    %c0_2 = arith.constant 0 : index
    %c0_3 = arith.constant 0 : index
    %c0_4 = arith.constant 0 : index
    %2 = vector.load %arg2[%c0_2, %c0_3, %c0_4] : memref<3x176x128xf32, #tpu.memory_space<vmem>>, vector<1x176x128xf32>
    %3 = vector.shape_cast %2 : vector<1x176x128xf32> to vector<176x128xf32>
    %cst = arith.constant dense<0.000000e+00> : vector<64x128xf32>
    %4 = tpu.matmul %1, %3, %cst {dimension_numbers = #tpu.dot_dimension_numbers<[1], [0], [0], [1], [0, 0, 1, 1], [], []>} : vector<64x176xf32>, vector<176x128xf32>, vector<64x128xf32> -> vector<64x128xf32>
    %c0_5 = arith.constant 0 : index
    %c0_6 = arith.constant 0 : index
    %5 = vector.load %arg5[%c0_5, %c0_6] : memref<64x128xf32, #tpu.memory_space<vmem>>, vector<64x128xf32>
    tpu.vector_store %arg5[%c0_5, %c0_6], %4 {strides = array<i32>} : memref<64x128xf32, #tpu.memory_space<vmem>>, vector<64x128xf32>,
    %c0_7 = arith.constant 0 : index
    %c0_8 = arith.constant 0 : index
    %6 = vector.load %arg5[%c0_7, %c0_8] : memref<64x128xf32, #tpu.memory_space<vmem>>, vector<64x128xf32>
    %c0_9 = arith.constant 0 : index
    %c3 = arith.constant 3 : index
    %c0_10 = arith.constant 0 : index
    %7 = vector.load %arg1[%c0_9, %c3, %c0_10] : memref<4x22x176xf32, #tpu.memory_space<vmem>>, vector<4x16x176xf32>
    %8 = vector.shape_cast %7 : vector<4x16x176xf32> to vector<64x176xf32>
    %c1 = arith.constant 1 : index
    %c0_11 = arith.constant 0 : index
    %c0_12 = arith.constant 0 : index
    %9 = vector.load %arg2[%c1, %c0_11, %c0_12] : memref<3x176x128xf32, #tpu.memory_space<vmem>>, vector<1x176x128xf32>
    %10 = vector.shape_cast %9 : vector<1x176x128xf32> to vector<176x128xf32>
    %cst_13 = arith.constant dense<0.000000e+00> : vector<64x128xf32>
    %11 = tpu.matmul %8, %10, %cst_13 {dimension_numbers = #tpu.dot_dimension_numbers<[1], [0], [0], [1], [0, 0, 1, 1], [], []>} : vector<64x176xf32>, vector<176x128xf32>, vector<64x128xf32> -> vector<64x128xf32>
    %12 = arith.addf %6, %11 : vector<64x128xf32>
    %c0_14 = arith.constant 0 : index
    %c0_15 = arith.constant 0 : index
    %13 = vector.load %arg5[%c0_14, %c0_15] : memref<64x128xf32, #tpu.memory_space<vmem>>, vector<64x128xf32>
    tpu.vector_store %arg5[%c0_14, %c0_15], %12 {strides = array<i32>} : memref<64x128xf32, #tpu.memory_space<vmem>>, vector<64x128xf32>,
    %c0_16 = arith.constant 0 : index
    %c0_17 = arith.constant 0 : index
    %14 = vector.load %arg5[%c0_16, %c0_17] : memref<64x128xf32, #tpu.memory_space<vmem>>, vector<64x128xf32>
    %c0_18 = arith.constant 0 : index
    %c6 = arith.constant 6 : index
    %c0_19 = arith.constant 0 : index
    %15 = vector.load %arg1[%c0_18, %c6, %c0_19] : memref<4x22x176xf32, #tpu.memory_space<vmem>>, vector<4x16x176xf32>
    %16 = vector.shape_cast %15 : vector<4x16x176xf32> to vector<64x176xf32>
    %c2 = arith.constant 2 : index
    %c0_20 = arith.constant 0 : index
    %c0_21 = arith.constant 0 : index
    %17 = vector.load %arg2[%c2, %c0_20, %c0_21] : memref<3x176x128xf32, #tpu.memory_space<vmem>>, vector<1x176x128xf32>
    %18 = vector.shape_cast %17 : vector<1x176x128xf32> to vector<176x128xf32>
    %cst_22 = arith.constant dense<0.000000e+00> : vector<64x128xf32>
    %19 = tpu.matmul %16, %18, %cst_22 {dimension_numbers = #tpu.dot_dimension_numbers<[1], [0], [0], [1], [0, 0, 1, 1], [], []>} : vector<64x176xf32>, vector<176x128xf32>, vector<64x128xf32> -> vector<64x128xf32>
    %20 = arith.addf %14, %19 : vector<64x128xf32>
    %c0_23 = arith.constant 0 : index
    %c0_24 = arith.constant 0 : index
    %21 = vector.load %arg5[%c0_23, %c0_24] : memref<64x128xf32, #tpu.memory_space<vmem>>, vector<64x128xf32>
    tpu.vector_store %arg5[%c0_23, %c0_24], %20 {strides = array<i32>} : memref<64x128xf32, #tpu.memory_space<vmem>>, vector<64x128xf32>,
    %c0_25 = arith.constant 0 : index
    %c0_26 = arith.constant 0 : index
    %22 = vector.load %arg5[%c0_25, %c0_26] : memref<64x128xf32, #tpu.memory_space<vmem>>, vector<64x128xf32>
    %c0_27 = arith.constant 0 : index
    %c0_28 = arith.constant 0 : index
    %23 = vector.load %arg3[%c0_27, %c0_28] : memref<1x128xf32, #tpu.memory_space<vmem>>, vector<1x128xf32>
    %24 = vector.broadcast %23 : vector<1x128xf32> to vector<64x128xf32>
    %25 = arith.addf %22, %24 : vector<64x128xf32>
    %cst_29 = arith.constant 0.000000e+00 : f32
    %26 = vector.broadcast %cst_29 : f32 to vector<64x128xf32>
    %27 = arith.maximumf %25, %26 : vector<64x128xf32>
    %28 = vector.shape_cast %27 : vector<64x128xf32> to vector<4x16x128xf32>
    %c0_30 = arith.constant 0 : index
    %c0_31 = arith.constant 0 : index
    %c0_32 = arith.constant 0 : index
    %29 = vector.load %arg4[%c0_30, %c0_31, %c0_32] : memref<4x16x128xf32, #tpu.memory_space<vmem>>, vector<4x16x128xf32>
    tpu.vector_store %arg4[%c0_30, %c0_31, %c0_32], %28 {strides = array<i32>} : memref<4x16x128xf32, #tpu.memory_space<vmem>>, vector<4x16x128xf32>,
    return
  }
  func.func @transform_0(%arg0: i32) -> (i32, i32, i32) {
    %c0_i32 = arith.constant 0 : i32
    %c0_i32_0 = arith.constant 0 : i32
    %c0_i32_1 = arith.constant 0 : i32
    return %arg0, %c0_i32, %c0_i32_0 : i32, i32, i32
  }
  func.func @transform_1(%arg0: i32) -> (i32, i32, i32) {
    %c0_i32 = arith.constant 0 : i32
    %c0_i32_0 = arith.constant 0 : i32
    %c0_i32_1 = arith.constant 0 : i32
    %c0_i32_2 = arith.constant 0 : i32
    return %c0_i32, %c0_i32_0, %c0_i32_1 : i32, i32, i32
  }
  func.func @transform_2(%arg0: i32) -> (i32, i32) {
    %c0_i32 = arith.constant 0 : i32
    %c0_i32_0 = arith.constant 0 : i32
    %c0_i32_1 = arith.constant 0 : i32
    return %c0_i32, %c0_i32_0 : i32, i32
  }
  func.func @transform_3(%arg0: i32) -> (i32, i32, i32) {
    %c0_i32 = arith.constant 0 : i32
    %c0_i32_0 = arith.constant 0 : i32
    %c0_i32_1 = arith.constant 0 : i32
    return %arg0, %c0_i32, %c0_i32_0 : i32, i32, i32
  }
}

</mosaic_0001>

<bundles_post_ra>
// kernel: tpu_custom_call.1
= control target key start
LH: loop header
LB: loop body
LE: loop exit
PB: predicated region body
PF: predicated region fallthrough
CT: control target
= control target key end

     0   :  { %8 = vsyncpa [#allocation4], 0  ;;  %s1682_s0 = inlined_call_operand.vmem [shape: f32[8,22,176], index: 0, kind: input, shape index: {}]   ;;  %s1683_s1 = inlined_call_operand.vmem [shape: f32[3,176,128], index: 1, kind: input, shape index: {}]   ;;  %s1684_s2 = inlined_call_operand.vmem [shape: f32[1,128], index: 2, kind: input, shape index: {}]   ;;  %s1685_s3 = inlined_call_operand.hbm [shape: f32[8,16,128], index: 3, kind: output, shape index: {}]  }
   0x1   :  { %10 = vsyncpa [#allocation4 + $0x1], 0  ;;  %s1151_s12 = smov 0   ;;  %s1153_s13 = smov 0  }
   0x2   :  { %s1155_s14 = smov 0   ;;  %s1157_s15 = smov 0  }
   0x3 LB: > { %s1172_s16 = sadd.s32 4294967295, %s1127_s15   ;;  %s927_s17 = sadd.s32 4294967294, %s1127_s15   ;;  %s1127_s15 = sphi %s1157_s15, %s1691_s15   ;;  %s1123_s14 = sphi %s1155_s14, %s1690_s14   ;;  %s1119_s13 = sphi %s1153_s13, %s1689_s13   ;;  %s1115_s12 = sphi %s1151_s12, %s1688_s12  }
   0x4   : > { %s1176_s18 = sadd.s32 1, %s1127_s15   ;;  %s91_s19 = sadd.s32 1, %s1123_s14 }
   0x5   : > { %s88_s20 = ssub.s32 %s1127_s15, %s1176_s18  ;;  %p101_p0 = scmp.ne.s32.totalorder %s1123_s14, %s1119_s13 }
   0x6   : > { %p89_p1 = scmp.eq.s32.totalorder %s88_s20, 0  ;;  %p102_p2 = scmp.eq.s32.totalorder %s1172_s16, 1 }
   0x7   : > { %p107_p3 = scmp.ne.s32.totalorder %s1119_s13, %s1115_s12  ;;  %p108_p4 = scmp.eq.s32.totalorder %s927_s17, 1 }
   0x8   : > { %s1187_s21 = scalar_select %p89_p1, %s1123_s14, %s91_s19  }
   0x9   : > { %p1189_p5 = por %p102_p2, %p101_p0  ;;  %p1193_p6 = por %p108_p4, %p107_p3 }
   0xa   : > { %p930_p7 = scmp.ge.s32.totalorder %s1127_s15, 1  ;;  %p142_p8 = scmp.lt.s32.totalorder %s1127_s15, 3 }
   0xc   : > { %p143_p9 = pnand %p930_p7, %p142_p8 }
   0xd   : > { %s932_s30 = sshll.u32 (!%p143_p9), %s1172_s16, 2  ;;  %s1009_s26 = sshll.u32 (!%p143_p9), %s1172_s16, 6 }
   0xe   : > { %146 = sbr.rel (%p143_p9) target bundleno = 280 (0x118), region = 32  ;;  %p168_p10 = scmp.lt.s32.totalorder (!%p143_p9), %s932_s30, 7 }
   0xf   : > { %s861_s29 = scalar_lea.hbm (!%p143_p9), %s1685_s3, %s1009_s26  ;;  %s1085_s11 = scalar_lea.hbm (!%p143_p9), %s1685_s3, 128 }
  0x10   : > { %s864_s16 = sshll.u32 (!%p143_p9), %s861_s29, 4  ;;  %s865_s16 = int_to_ptr.hbm [resolvable:$true] %s864_s16 }
  0x11   : > { %s1079_s7 = sshra.s32 (!%p143_p9), %s865_s16, 4  ;;  %s1080_s7 = int_to_ptr.hbm [resolvable:$true] %s1079_s7 }
  0x12   : > { %s1081_s8 = scalar_lea.hbm (!%p143_p9), %s1080_s7, 64  ;;  %p1086_p0 = scmp.lt.s32.totalorder (!%p143_p9), %s1080_s7, %s1685_s3 }
  0x13   : > { %v206_v0 = vld [vmem:[%s1683_s1 + $0x78] sm:$0xff]  ;;  %v957_v1 = vld [vmem:[%s1683_s1 + $0x128] sm:$0xff]  ;;  %v205_v3 = vld [vmem:[%s1683_s1 + $0x70] sm:$0xff]  ;;  %s1693_s30 = smov (!%p168_p10, %s932_s30), 7  ;;  %vm384_vm0 = vcmask 1044480   ;;  %vm213_vm1 = vcmask 392192   ;;  %p1082_p11 = scmp.ne.s32.totalorder %s1080_s7, %s1081_s8 }
  0x14   : > { %v1208_v2 = vld [vmem:[%s1683_s1 + $0x158] sm:$0xff]  ;;  %238 = vmatpush.msra.mxu0 %v206_v0  ;;  %472 = vmatpush.msra.mxu2 %v957_v1  ;;  %v956_v4 = vld [vmem:[%s1683_s1 + $0x120] sm:$0xff]  ;;  %v1220_v5 = vld [vmem:[%s1683_s1 + $0x150] sm:$0xff]  ;;  %s1022_s9 = smul.u32 48, %s1693_s30  ;;  %vm626_vm2 = vcmask 1041408   ;;  %p1087_p1 = scmp.lt.s32.totalorder %s1085_s11, %s1081_s8 }
  0x15   : > { %1016 = vmatpush.msra.mxu3 %v1208_v2  ;;  %v204_v6 = vld [vmem:[%s1683_s1 + $0x68] sm:$0xff]  ;;  %v955_v7 = vld [vmem:[%s1683_s1 + $0x118] sm:$0xff]  ;;  %v203_v10 = vld [vmem:[%s1683_s1 + $0x60] sm:$0xff]  ;;  %p1083_p12 = pnand %p1082_p11, %p1189_p5 }
  0x16   : > { %239 = vmatpush.msra.mxu0 %v205_v3  ;;  %473 = vmatpush.msra.mxu2 %v956_v4  ;;  %v1232_v8 = vld [vmem:[%s1683_s1 + $0x148] sm:$0xff]  ;;  %v954_v11 = vld [vmem:[%s1683_s1 + $0x110] sm:$0xff]  ;;  %v1250_v12 = vld [vmem:[%s1683_s1 + $0xa0] sm:$0xff]  ;;  %s1281_s4 = scalar_lea.vmem %s1682_s0, %s1022_s9  ;;  %p1088_p2 = por %p1087_p1, %p1086_p0 }
  0x17   : > { %v1237_v9 = vld [vmem:[%s1683_s1 + $0xa8] sm:$0xff]  ;;  %1017 = vmatpush.msra.mxu3 %v1220_v5  ;;  %v1255_v13 = vld [vmem:[%s1683_s1 + $0x140] sm:$0xff]  ;;  %v202_v14 = vld [vmem:[%s1683_s1 + $0x58] sm:$0xff]  ;;  %p1084_p13 = pneg %p1083_p12 }
  0x18   : > { %1010 = vmatpush.msra.mxu1 %v1237_v9  ;;  %240 = vmatpush.msra.mxu0 %v204_v6  ;;  %v953_v15 = vld [vmem:[%s1683_s1 + $0x108] sm:$0xff]  ;;  %v1268_v16 = vld [vmem:[%s1683_s1 + $0x98] sm:$0xff]  ;;  %v201_v18 = vld [vmem:[%s1683_s1 + $0x50] sm:$0xff] }
  0x19   : > { %474 = vmatpush.msra.mxu2 %v955_v7  ;;  %1018 = vmatpush.msra.mxu3 %v1232_v8  ;;  %v1273_v17 = vld [vmem:[%s1683_s1 + $0x138] sm:$0xff]  ;;  %v1286_v19 = vld [vmem:[%s1683_s1 + $0x90] sm:$0xff]  ;;  %v952_v20 = vld [vmem:[%s1683_s1 + $0x100] sm:$0xff]  ;;  %p1089_p3 = pnand %p1088_p2, %p1084_p13 }
  0x1a   : > { %1011 = vmatpush.msra.mxu1 %v1250_v12  ;;  %241 = vmatpush.msra.mxu0 %v203_v10  ;;  %v343_v21 = vld [vmem:[%s1281_s4 + $0x38] sm:$0xf8]  ;;  %v1295_v22 = vld [vmem:[%s1281_s4 + $0x48] sm:$0xff]  ;;  %v1300_v23 = vld [vmem:[%s1683_s1 + $0x130] sm:$0xff] }
  0x1b   : > { %475 = vmatpush.msra.mxu2 %v954_v11  ;;  %1019 = vmatpush.msra.mxu3 %v1255_v13  ;;  %v398_v24 = vrot.slane %v343_v21, 3  ;;  %v399_v25 = vrot.slane %v1295_v22, 3  ;;  %v1306_v26 = vld [vmem:[%s1683_s1 + $0x88] sm:$0xff]  ;;  %v951_v30 = vld [vmem:[%s1683_s1 + $0xf8] sm:$0xff]  ;;  %v199_v31 = vld [vmem:[%s1683_s1 + $0x40] sm:$0xff] }
  0x1c   : > { %1012 = vmatpush.msra.mxu1 %v1268_v16  ;;  %242 = vmatpush.msra.mxu0 %v202_v14  ;;  %v200_v27 = vld [vmem:[%s1683_s1 + $0x48] sm:$0xff]  ;;  %v1328_v32 = vld [vmem:[%s1683_s1 + $0x80] sm:$0xff]  ;;  %v347_v33 = vld [vmem:[%s1281_s4 + $0x58] sm:$0x7] }
  0x1d   : > { %476 = vmatpush.msra.mxu2 %v953_v15  ;;  %1020 = vmatpush.msra.mxu3 %v1273_v17  ;;  %v400_v28 = vsel %vm384_vm0, %v398_v24, %v399_v25  ;;  %v993_v29 = vld [vmem:[%s1683_s1 + $0x208] sm:$0xff]  ;;  %v950_v34 = vld [vmem:[%s1683_s1 + $0xf0] sm:$0xff]  ;;  %v180_v35 = vld [vmem:[%s1281_s4 + $0x38] sm:$0xff]  ;;  %v403_v38 = vrot.slane %v347_v33, 3 }
  0x1e   : > { %1013 = vmatpush.msra.mxu1 %v1286_v19  ;;  %243 = vmatpush.msra.mxu0 %v201_v18  ;;  %v198_v36 = vld [vmem:[%s1683_s1 + $0x38] sm:$0xff]  ;;  %v949_v39 = vld [vmem:[%s1683_s1 + $0xe8] sm:$0xff]  ;;  %v992_v40 = vld [vmem:[%s1683_s1 + $0x200] sm:$0xff] }
  0x1f   : > { %477 = vmatpush.msra.mxu2 %v952_v20  ;;  %1021 = vmatpush.msra.mxu3 %v1300_v23  ;;  %v987_v37 = vld [vmem:[%s1683_s1 + $0x1d8] sm:$0xff]  ;;  %v197_v41 = vld [vmem:[%s1683_s1 + $0x30] sm:$0xff]  ;;  %v948_v43 = vld [vmem:[%s1683_s1 + $0xe0] sm:$0xff]  ;;  %v404_v45 = vsel %vm384_vm0, %v399_v25, %v403_v38 }
  0x20   : > { %1014 = vmatpush.msra.mxu1 %v1306_v26  ;;  %966 = vmatmul.msk.f32.vlgmr.msra.gmra.mxu3 %vm213_vm1, %v400_v28  ;;  %v986_v42 = vld [vmem:[%s1683_s1 + $0x1d0] sm:$0xff]  ;;  %v991_v44 = vld [vmem:[%s1683_s1 + $0x1f8] sm:$0xff]  ;;  %v196_v46 = vld [vmem:[%s1683_s1 + $0x28] sm:$0xff] }
  0x21   : > { %244 = vmatpush.msra.mxu0 %v200_v27  ;;  %765 = vmatpush.msrb.mxu3 %v993_v29  ;;  %v947_v47 = vld [vmem:[%s1683_s1 + $0xd8] sm:$0xff]  ;;  %v985_v48 = vld [vmem:[%s1683_s1 + $0x1c8] sm:$0xff]  ;;  %v195_v51 = vld [vmem:[%s1683_s1 + $0x20] sm:$0xff] }
  0x22   : > { %478 = vmatpush.msra.mxu2 %v951_v30  ;;  %1015 = vmatpush.msra.mxu1 %v1328_v32  ;;  %v349_v49 = vld [vmem:[%s1281_s4 + $0x68] sm:$0xf8]  ;;  %v1374_v50 = vld [vmem:[%s1281_s4 + $0x78] sm:$0xff]  ;;  %v946_v52 = vld [vmem:[%s1683_s1 + $0xd0] sm:$0xff] }
  0x23   : > { %245 = vmatpush.msra.mxu0 %v199_v31  ;;  %936 = vmatmul.msk.f32.vlgmr.msra.gmra.mxu1 %vm213_vm1, %v180_v35  ;;  %v990_v53 = vld [vmem:[%s1683_s1 + $0x1f0] sm:$0xff]  ;;  %v194_v54 = vld [vmem:[%s1683_s1 + $0x18] sm:$0xff]  ;;  %v945_v55 = vld [vmem:[%s1683_s1 + $0xc8] sm:$0xff]  ;;  %v408_v57 = vrot.slane %v349_v49, 3  ;;  %v409_v58 = vrot.slane %v1374_v50, 3 }
  0x24   : > { %479 = vmatpush.msra.mxu2 %v950_v34  ;;  %714 = vmatpush.msrb.mxu1 %v987_v37  ;;  %v984_v56 = vld [vmem:[%s1683_s1 + $0x1c0] sm:$0xff]  ;;  %v1398_v60 = vld [vmem:[%s1281_s4 + $0x10] sm:$0xff]  ;;  %v989_v61 = vld [vmem:[%s1683_s1 + $0x1e8] sm:$0xff] }
  0x25   : > { %246 = vmatpush.msra.mxu0 %v198_v36  ;;  %766 = vmatpush.msrb.mxu3 %v992_v40  ;;  %v336_v59 = vld [vmem:[%s1281_s4] sm:$0xf8]  ;;  %v193_v62 = vld [vmem:[%s1683_s1 + $0x10] sm:$0xff]  ;;  %v983_v63 = vld [vmem:[%s1683_s1 + $0x1b8] sm:$0xff]  ;;  %v410_v1 = vsel %vm384_vm0, %v408_v57, %v409_v58  ;;  %v386_v6 = vrot.slane %v1398_v60, 3 }
  0x26   : > { %480 = vmatpush.msra.mxu2 %v949_v39  ;;  %715 = vmatpush.msrb.mxu1 %v986_v42  ;;  %v944_v0 = vld [vmem:[%s1683_s1 + $0xc0] sm:$0xff]  ;;  %v192_v3 = vld [vmem:[%s1683_s1 + $0x8] sm:$0xff]  ;;  %v385_v4 = vrot.slane %v336_v59, 3  ;;  %v943_v10 = vld [vmem:[%s1683_s1 + $0xb8] sm:$0xff] }
  0x27   : > { %247 = vmatpush.msra.mxu0 %v197_v41  ;;  %767 = vmatpush.msrb.mxu3 %v991_v44  ;;  %v988_v7 = vld [vmem:[%s1683_s1 + $0x1e0] sm:$0xff]  ;;  %v982_v11 = vld [vmem:[%s1683_s1 + $0x1b0] sm:$0xff]  ;;  %v353_v14 = vld [vmem:[%s1281_s4 + $0x88] sm:$0x7] }
  0x28   : > { %481 = vmatpush.msra.mxu2 %v948_v43  ;;  %967 = vmatmul.msk.f32.gmra.mxu3 %vm213_vm1, %v404_v45  ;;  %v191_v15 = vld [vmem:[%s1683_s1] sm:$0xff]  ;;  %v942_v18 = vld [vmem:[%s1683_s1 + $0xb0] sm:$0xff]  ;;  %v387_v21 = vsel %vm384_vm0, %v385_v4, %v386_v6  ;;  %v184_v24 = vld [vmem:[%s1281_s4 + $0x68] sm:$0xff]  ;;  %v413_v25 = vrot.slane %v353_v14, 3 }
  0x29   : > { %248 = vmatpush.msra.mxu0 %v196_v46  ;;  %716 = vmatpush.msrb.mxu1 %v985_v48  ;;  %v175_v20 = vld [vmem:[%s1281_s4] sm:$0xff]  ;;  %v981_v27 = vld [vmem:[%s1683_s1 + $0x1a8] sm:$0xff]  ;;  %v979_v33 = vld [vmem:[%s1683_s1 + $0x198] sm:$0xff] }
  0x2a   : > { %482 = vmatpush.msra.mxu2 %v947_v47  ;;  %768 = vmatpush.msrb.mxu3 %v990_v53  ;;  %v340_v28 = vld [vmem:[%s1281_s4 + $0x20] sm:$0x7]  ;;  %v414_v30 = vsel %vm384_vm0, %v409_v58, %v413_v25  ;;  %v355_v34 = vld [vmem:[%s1281_s4 + $0x98] sm:$0xf8]  ;;  %v1454_v35 = vld [vmem:[%s1281_s4 + $0xa8] sm:$0xff] }
  0x2b   : > { %249 = vmatpush.msra.mxu0 %v195_v51  ;;  %937 = vmatmul.msk.f32.gmra.mxu1 %vm213_vm1, %v1295_v22  ;;  %v980_v29 = vld [vmem:[%s1683_s1 + $0x1a0] sm:$0xff]  ;;  %v391_v31 = vrot.slane %v340_v28, 3  ;;  %v978_v36 = vld [vmem:[%s1683_s1 + $0x190] sm:$0xff]  ;;  %v418_v37 = vrot.slane %v355_v34, 3  ;;  %v419_v38 = vrot.slane %v1454_v35, 3  ;;  %v975_v42 = vld [vmem:[%s1683_s1 + $0x178] sm:$0xff] }
  0x2c   : > { %483 = vmatpush.msra.mxu2 %v946_v52  ;;  %717 = vmatpush.msrb.mxu1 %v984_v56  ;;  %v1468_v39 = vld [vmem:[%s1281_s4 + $0x40] sm:$0xff]  ;;  %v179_v43 = vld [vmem:[%s1281_s4 + $0x30] sm:$0xff]  ;;  %v188_v45 = vld [vmem:[%s1281_s4 + $0x98] sm:$0xff] }
  0x2d   : > { %250 = vmatpush.msra.mxu0 %v194_v54  ;;  %769 = vmatpush.msrb.mxu3 %v989_v61  ;;  %v396_v41 = vrot.slane %v1468_v39, 3  ;;  %v974_v44 = vld [vmem:[%s1683_s1 + $0x170] sm:$0xff]  ;;  %v579_v48 = vld [vmem:[%s1281_s4 + $0x8] sm:$0xc0]  ;;  %v1510_v49 = vld [vmem:[%s1281_s4 + $0x18] sm:$0xff]  ;;  %v628_v61 = vrot.slane %v1398_v60, 6 }
  0x2e   : > { %484 = vmatpush.msra.mxu2 %v945_v55  ;;  %718 = vmatpush.msrb.mxu1 %v983_v63  ;;  %v630_v51 = vrot.slane %v579_v48, 6  ;;  %v631_v52 = vrot.slane %v1510_v49, 6  ;;  %v348_v53 = vld [vmem:[%s1281_s4 + $0x60] sm:$0xf8]  ;;  %v1517_v54 = vld [vmem:[%s1281_s4 + $0x70] sm:$0xff] }
  0x2f   : > { %251 = vmatpush.msra.mxu0 %v193_v62  ;;  %770 = vmatpush.msrb.mxu3 %v988_v7  ;;  %v578_v55 = vld [vmem:[%s1281_s4] sm:$0xc0]  ;;  %v405_v56 = vrot.slane %v348_v53, 3  ;;  %v406_v58 = vrot.slane %v1517_v54, 3  ;;  %v583_v62 = vld [vmem:[%s1281_s4 + $0x28] sm:$0x3f] }
  0x30   : > { %485 = vmatpush.msra.mxu2 %v944_v0  ;;  %968 = vmatmul.msk.f32.gmra.mxu3 %vm213_vm1, %v410_v1  ;;  %v632_v57 = vsel %vm626_vm2, %v630_v51, %v631_v52  ;;  %v627_v59 = vrot.slane %v578_v55, 6  ;;  %v183_v63 = vld [vmem:[%s1281_s4 + $0x60] sm:$0xff]  ;;  %v584_v25 = vld [vmem:[%s1281_s4 + $0x30] sm:$0xc0]  ;;  %v341_v48 = vld [vmem:[%s1281_s4 + $0x28] sm:$0x7] }
  0x31   : > { %252 = vmatpush.msra.mxu0 %v192_v3  ;;  %719 = vmatpush.msrb.mxu1 %v982_v11  ;;  %v407_v0 = vsel %vm384_vm0, %v405_v56, %v406_v58  ;;  %v635_v3 = vrot.slane %v583_v62, 6  ;;  %v352_v4 = vld [vmem:[%s1281_s4 + $0x80] sm:$0x7]  ;;  %v585_v11 = vld [vmem:[%s1281_s4 + $0x38] sm:$0xc0] }
  0x32   : > { %486 = vmatpush.msra.mxu2 %v943_v10  ;;  %v629_v1 = vsel %vm626_vm2, %v627_v59, %v628_v61  ;;  %v640_v14 = vrot.slane %v585_v11, 6  ;;  %v596_v59 = vld [vmem:[%s1281_s4 + $0x90] sm:$0xc0] }
  0x33   : > { %253 = vmatpush.msra.mxu0 %v191_v15  ;;  %938 = vmatmul.msk.f32.gmra.mxu1 %vm213_vm1, %v184_v24  ;;  %v636_v7 = vsel %vm626_vm2, %v631_v52, %v635_v3  ;;  %v641_v15 = vrot.slane %v1295_v22, 6  ;;  %v1541_v24 = vld [vmem:[%s1281_s4 + $0xa0] sm:$0xff]  ;;  %v393_v52 = vrot.slane %v341_v48, 3  ;;  %v657_v62 = vrot.slane %v596_v59, 6 }
  0x34   : > { %487 = vmatpush.msra.mxu2 %v942_v18  ;;  %254 = vmatmul.f32.vlgmr.msra.gmra.mxu0 %v175_v20  ;;  %v416_v22 = vrot.slane %v1541_v24, 3 }
  0x35   : > { %488 = vmatmul.f32.vlgmr.msra.gmra.mxu2 %v387_v21  ;;  %720 = vmatpush.msrb.mxu1 %v981_v27  ;;  %v354_v21 = vld [vmem:[%s1281_s4 + $0x90] sm:$0xf8]  ;;  %v642_v27 = vsel %vm626_vm2, %v640_v14, %v641_v15 }
  0x36   : > { %523 = vmatpush.msrb.mxu2 %v1208_v2  ;;  %289 = vmatpush.msrb.mxu0 %v1237_v9  ;;  %v392_v2 = vsel %vm384_vm0, %v386_v6, %v391_v31  ;;  %v342_v9 = vld [vmem:[%s1281_s4 + $0x30] sm:$0xf8]  ;;  %v582_v6 = vld [vmem:[%s1281_s4 + $0x20] sm:$0x3f]  ;;  %v415_v28 = vrot.slane %v354_v21, 3 }
  0x37   : > { %721 = vmatpush.msrb.mxu1 %v980_v29  ;;  %v395_v40 = vrot.slane %v342_v9, 3  ;;  %v633_v10 = vrot.slane %v582_v6, 6  ;;  %v637_v29 = vrot.slane %v584_v25, 6  ;;  %v589_v31 = vld [vmem:[%s1281_s4 + $0x58] sm:$0x3f] }
  0x38   : > { %524 = vmatpush.msrb.mxu2 %v1220_v5  ;;  %969 = vmatmul.msk.f32.gmra.mxu3 %vm213_vm1, %v414_v30  ;;  %v977_v5 = vld [vmem:[%s1683_s1 + $0x188] sm:$0xff]  ;;  %v638_v30 = vrot.slane %v1468_v39, 6  ;;  %v417_v34 = vsel %vm384_vm0, %v415_v28, %v416_v22 }
  0x39   : > { %290 = vmatpush.msrb.mxu0 %v1250_v12  ;;  %722 = vmatpush.msrb.mxu1 %v979_v33  ;;  %v420_v12 = vsel %vm384_vm0, %v418_v37, %v419_v38  ;;  %v634_v20 = vsel %vm626_vm2, %v628_v61, %v633_v10  ;;  %v187_v33 = vld [vmem:[%s1281_s4 + $0x90] sm:$0xff] }
  0x3a   : > { %525 = vmatpush.msrb.mxu2 %v1232_v8  ;;  %v976_v8 = vld [vmem:[%s1683_s1 + $0x180] sm:$0xff]  ;;  %v358_v37 = vld [vmem:[%s1281_s4 + $0xb0] sm:$0x7] }
  0x3b   : > { %291 = vmatpush.msrb.mxu0 %v1268_v16  ;;  %723 = vmatpush.msrb.mxu1 %v978_v36  ;;  %v359_v16 = vld [vmem:[%s1281_s4 + $0xb8] sm:$0x7]  ;;  %v639_v36 = vsel %vm626_vm2, %v637_v29, %v638_v30 }
  0x3c   : > { %257 = vmatmul.f32.gmra.mxu0 %v1398_v60  ;;  %939 = vmatmul.msk.f32.gmra.mxu1 %vm213_vm1, %v1374_v50  ;;  %v423_v46 = vrot.slane %v359_v16, 3  ;;  %v411_v60 = vrot.slane %v352_v4, 3  ;;  %v600_v4 = vld [vmem:[%s1281_s4 + $0xb0] sm:$0x3f] }
  0x3d   : > { %491 = vmatmul.f32.gmra.mxu2 %v392_v2  ;;  %724 = vmatpush.msrb.mxu1 %v977_v5  ;;  %v645_v2 = vrot.slane %v589_v31, 6  ;;  %v421_v5 = vrot.slane %v358_v37, 3  ;;  %v663_v6 = vrot.slane %v600_v4, 6 }
  0x3e   : > { %526 = vmatpush.msrb.mxu2 %v1255_v13  ;;  %292 = vmatpush.msrb.mxu0 %v1286_v19  ;;  %v397_v13 = vsel %vm384_vm0, %v395_v40, %v396_v41  ;;  %v346_v19 = vld [vmem:[%s1281_s4 + $0x50] sm:$0x7]  ;;  %v412_v18 = vsel %vm384_vm0, %v406_v58, %v411_v60  ;;  %v651_v40 = vrot.slane %v1374_v50, 6  ;;  %v648_v50 = vrot.slane %v1517_v54, 6 }
  0x3f   : > { %725 = vmatpush.msrb.mxu1 %v976_v8  ;;  %v401_v47 = vrot.slane %v346_v19, 3  ;;  %v646_v9 = vsel %vm626_vm2, %v641_v15, %v645_v2  ;;  %v591_v8 = vld [vmem:[%s1281_s4 + $0x68] sm:$0xc0]  ;;  %v595_v19 = vld [vmem:[%s1281_s4 + $0x88] sm:$0x3f]  ;;  %v661_v58 = vrot.slane %v1454_v35, 6 }
  0x40   : > { %527 = vmatpush.msrb.mxu2 %v1273_v17  ;;  %970 = vmatmul.msk.f32.gmra.mxu3 %vm213_vm1, %v420_v12  ;;  %v973_v17 = vld [vmem:[%s1683_s1 + $0x168] sm:$0xff]  ;;  %v650_v12 = vrot.slane %v591_v8, 6 }
  0x41   : > { %293 = vmatpush.msrb.mxu0 %v1306_v26  ;;  %726 = vmatpush.msrb.mxu1 %v975_v42  ;;  %v972_v26 = vld [vmem:[%s1683_s1 + $0x160] sm:$0xff]  ;;  %v337_v42 = vld [vmem:[%s1281_s4 + $0x8] sm:$0xf8] }
  0x42   : > { %528 = vmatpush.msrb.mxu2 %v1300_v23  ;;  %v424_v23 = vsel %vm384_vm0, %v419_v38, %v423_v46  ;;  %v588_v38 = vld [vmem:[%s1281_s4 + $0x50] sm:$0x3f] }
  0x43   : > { %294 = vmatpush.msrb.mxu0 %v1328_v32  ;;  %727 = vmatpush.msrb.mxu1 %v974_v44  ;;  %v402_v32 = vsel %vm384_vm0, %v396_v41, %v401_v47  ;;  %v422_v41 = vsel %vm384_vm0, %v416_v22, %v421_v5  ;;  %v652_v44 = vsel %vm626_vm2, %v650_v12, %v651_v40  ;;  %v655_v47 = vrot.slane %v595_v19, 6 }
  0x44   : > { %260 = vmatmul.f32.gmra.mxu0 %v179_v43  ;;  %940 = vmatmul.msk.f32.gmra.mxu1 %vm213_vm1, %v188_v45  ;;  %v590_v43 = vld [vmem:[%s1281_s4 + $0x60] sm:$0xc0]  ;;  %v389_v45 = vrot.slane %v1510_v49, 3 }
  0x45   : > { %494 = vmatmul.f32.gmra.mxu2 %v397_v13  ;;  %728 = vmatpush.msrb.mxu1 %v973_v17  ;;  %v388_v13 = vrot.slane %v337_v42, 3  ;;  %v647_v46 = vrot.slane %v590_v43, 6  ;;  %v176_v17 = vld [vmem:[%s1281_s4 + $0x8] sm:$0xff]  ;;  %v656_v51 = vsel %vm626_vm2, %v651_v40, %v655_v47 }
  0x46   : > { %v394_v55 = vsel %vm384_vm0, %v389_v45, %v393_v52 }
  0x47   : > { %729 = vmatpush.msrb.mxu1 %v972_v26  ;;  %v390_v26 = vsel %vm384_vm0, %v388_v13, %v389_v45  ;;  %v1615_v45 = vld [vmem:[%s1684_s2] ss:$0 sm:$0xff] }
  0x48   : > { %971 = vmatmul.msk.f32.gmra.mxu3 %vm213_vm1, %v424_v23  ;;  %v649_v23 = vsel %vm626_vm2, %v647_v46, %v648_v50 }
  0x4c   : > { %263 = vmatmul.f32.gmra.mxu0 %v1468_v39  ;;  %941 = vmatmul.msk.f32.gmra.mxu1 %vm213_vm1, %v1454_v35  ;;  %v643_v39 = vrot.slane %v588_v38, 6 }
  0x4d   : > { %497 = vmatmul.f32.gmra.mxu2 %v402_v32  ;;  %v594_v32 = vld [vmem:[%s1281_s4 + $0x80] sm:$0x3f] }
  0x4e   : > { %v644_v16 = vsel %vm626_vm2, %v638_v30, %v643_v39  ;;  %v653_v53 = vrot.slane %v594_v32, 6 }
  0x50   : > { %994 = vmatmul.msk.f32.vlgmr.msrb.gmra.mxu3 %vm213_vm1, %v632_v57  ;;  %v654_v56 = vsel %vm626_vm2, %v648_v50, %v653_v53 }
  0x54   : > { %266 = vmatmul.f32.gmra.mxu0 %v183_v63  ;;  %730 = vmatmul.f32.vlgmr.msrb.gmra.mxu1 %v629_v1  ;;  %v658_v63 = vrot.slane %v1541_v24, 6 }
  0x55   : > { %500 = vmatmul.f32.gmra.mxu2 %v407_v0  ;;  %v601_v0 = vld [vmem:[%s1281_s4 + $0xb8] sm:$0x3f] }
  0x56   : > { %v659_v1 = vsel %vm626_vm2, %v657_v62, %v658_v63  ;;  %v665_v3 = vrot.slane %v601_v0, 6 }
  0x58   : > { %995 = vmatmul.msk.f32.gmra.mxu3 %vm213_vm1, %v636_v7  ;;  %v666_v35 = vsel %vm626_vm2, %v661_v58, %v665_v3 }
  0x5c   : > { %269 = vmatmul.f32.gmra.mxu0 %v1517_v54  ;;  %733 = vmatmul.f32.gmra.mxu1 %v634_v20  ;;  %v597_v54 = vld [vmem:[%s1281_s4 + $0x98] sm:$0xc0]  ;;  %s164_s4 = sand.u32 1, %s1119_s13  }
  0x5d   : > { %503 = vmatmul.f32.gmra.mxu2 %v412_v18  ;;  %v660_v57 = vrot.slane %v597_v54, 6  ;;  %s931_s30 = sshll.u32 %s164_s4, 6  ;;  %s849_s6 = scalar_lea.sflag [#allocation4], %s164_s4 }
  0x5e   : > { %s1622_s25 = scalar_lea.vmem [#allocation3], %s931_s30 }
  0x5f   : > { %v662_v61 = vsel %vm626_vm2, %v660_v57, %v661_v58  ;;  %s862_s5 = sshll.u32 %s1622_s25, 4  ;;  %s863_s5 = int_to_ptr.vmem [resolvable:$true] %s862_s5 }
  0x60   : > { %996 = vmatmul.msk.f32.gmra.mxu3 %vm213_vm1, %v642_v27 }
  0x64   : > { %272 = vmatmul.f32.gmra.mxu0 %v187_v33  ;;  %736 = vmatmul.f32.gmra.mxu1 %v639_v36 }
  0x65   : > { %506 = vmatmul.f32.gmra.mxu2 %v417_v34 }
  0x68   : > { %997 = vmatmul.msk.f32.gmra.mxu3 %vm213_vm1, %v646_v9 }
  0x6c   : > { %275 = vmatmul.f32.gmra.mxu0 %v1541_v24  ;;  %739 = vmatmul.f32.gmra.mxu1 %v644_v16 }
  0x6d   : > { %509 = vmatmul.f32.gmra.mxu2 %v422_v41 }
  0x70   : > { %998 = vmatmul.msk.f32.gmra.mxu3 %vm213_vm1, %v652_v44 }
  0x74   : > { %934 = vmatmul.msk.f32.vlgmr.msrb.gmra.mxu0 %vm213_vm1, %v176_v17  ;;  %742 = vmatmul.f32.gmra.mxu1 %v649_v23 }
  0x75   : > { %964 = vmatmul.msk.f32.vlgmr.msrb.gmra.mxu2 %vm213_vm1, %v390_v26 }
  0x78   : > { %999 = vmatmul.msk.f32.gmra.mxu3 %vm213_vm1, %v656_v51 }
  0x7c   : > { %935 = vmatmul.msk.f32.gmra.mxu0 %vm213_vm1, %v1510_v49  ;;  %745 = vmatmul.f32.gmra.mxu1 %v654_v56  ;;  %v664_v49 = vsel %vm626_vm2, %v658_v63, %v663_v6 }
  0x7d   : > { %965 = vmatmul.msk.f32.gmra.mxu2 %vm213_vm1, %v394_v55 }
  0x80   : > { %1000 = vmatmul.msk.f32.gmra.mxu3 %vm213_vm1, %v662_v61 }
  0x84   : > { %748 = vmatmul.f32.gmra.mxu1 %v659_v1 }
  0x88   : > { %1001 = vmatmul.msk.f32.gmra.mxu3 %vm213_vm1, %v666_v35 }
  0x8c   : > { %751 = vmatmul.f32.gmra.mxu1 %v664_v49 }
  0xa0   : > { %v302_v7 = vpop.f32.mrf.mxu1 }
  0xa3   : > { %v536_v60 = vpop.f32.mrf.mxu3 }
  0xa8   : > { %v305_v10 = vpop.f32.mrf.mxu1 }
  0xab   : > { %v539_v11 = vpop.f32.mrf.mxu3 }
  0xb0   : > { %v308_v15 = vpop.f32.mrf.mxu1 }
  0xb1   : > { %v255_v14 = vpop.f32.mrf.mxu0 }
  0xb3   : > { %v542_v18 = vpop.f32.mrf.mxu3 }
  0xb8   : > { %v489_v20 = vpop.f32.mrf.mxu2 }
  0xb9   : > { %v1595_v21 = vpop.f32.mrf.mxu0  ;;  %v311_v24 = vpop.f32.mrf.mxu1 }
  0xbb   : > { %v545_v25 = vpop.f32.mrf.mxu3 }
  0xc0   : > { %v1597_v27 = vpop.f32.mrf.mxu2 }
  0xc1   : > { %v261_v28 = vpop.f32.mrf.mxu0  ;;  %v1599_v22 = vpop.f32.mrf.mxu1 }
  0xc2   : > { %v303_v42 = vadd.f32 %v302_v7, %v261_v28 }
  0xc3   : > { %v1601_v29 = vpop.f32.mrf.mxu3 }
  0xc8   : > { %v495_v30 = vpop.f32.mrf.mxu2 }
  0xc9   : > { %v264_v31 = vpop.f32.mrf.mxu0  ;;  %v1603_v33 = vpop.f32.mrf.mxu1  ;;  %v537_v40 = vadd.f32 %v536_v60, %v495_v30 }
  0xca   : > { %v306_v47 = vadd.f32 %v305_v10, %v264_v31 }
  0xcb   : > { %v1605_v34 = vpop.f32.mrf.mxu3  ;;  %v556_v44 = vadd.f32 %v537_v40, %v303_v42 }
  0xd0   : > { %v498_v36 = vpop.f32.mrf.mxu2 }
  0xd1   : > { %v267_v2 = vpop.f32.mrf.mxu0  ;;  %v731_v37 = vpop.f32.mrf.mxu1  ;;  %v540_v19 = vadd.f32 %v539_v11, %v498_v36 }
  0xd2   : > { %v309_v58 = vadd.f32 %v308_v15, %v267_v2 }
  0xd3   : > { %v772_v38 = vpop.f32.mrf.mxu3  ;;  %v557_v51 = vadd.f32 %v540_v19, %v306_v47 }
  0xd4   : > { %v773_v60 = vadd.f32 %v772_v38, %v731_v37 }
  0xd8   : > { %v501_v9 = vpop.f32.mrf.mxu2 }
  0xd9   : > { %v270_v5 = vpop.f32.mrf.mxu0  ;;  %v1607_v39 = vpop.f32.mrf.mxu1  ;;  %v543_v55 = vadd.f32 %v542_v18, %v501_v9 }
  0xda   : > { %v312_v10 = vadd.f32 %v311_v24, %v270_v5 }
  0xdb   : > { %v1609_v8 = vpop.f32.mrf.mxu3  ;;  %v558_v63 = vadd.f32 %v543_v55, %v309_v58 }
  0xe0   : > { %v504_v12 = vpop.f32.mrf.mxu2 }
  0xe1   : > { %v273_v41 = vpop.f32.mrf.mxu0  ;;  %v737_v16 = vpop.f32.mrf.mxu1  ;;  %v546_v4 = vadd.f32 %v545_v25, %v504_v12  ;;  %v776_v12 = vadd.f32 %v1609_v8, %v1607_v39 }
  0xe2   : > { %v315_v40 = vadd.f32 %v1599_v22, %v273_v41 }
  0xe3   : > { %v778_v43 = vpop.f32.mrf.mxu3  ;;  %v559_v28 = vadd.f32 %v546_v4, %v312_v10 }
  0xe4   : > { %v779_v13 = vadd.f32 %v778_v43, %v737_v16 }
  0xe6   : > { %v798_v46 = vadd.f32 %v779_v13, %v556_v44 }
  0xe8   : > { %v507_v50 = vpop.f32.mrf.mxu2  ;;  %v826_v17 = vadd.f32 %v1615_v45, %v798_v46 }
  0xe9   : > { %v1620_v26 = vpop.f32.mrf.mxu0  ;;  %v740_v23 = vpop.f32.mrf.mxu1 }
  0xea   : > { %v834_v48 = vmax.f32 %v826_v17, 0.0  ;;  %v318_v8 = vadd.f32 %v1603_v33, %v1620_v26 }
  0xeb   : > { %v781_v32 = vpop.f32.mrf.mxu3 }
  0xec   : > { %842 = vst [vmem:[%s1622_s25 + $0x10] sm:$0xff] %v834_v48  ;;  %v782_v52 = vadd.f32 %v781_v32, %v740_v23 }
  0xee   : > { %v799_v53 = vadd.f32 %v782_v52, %v557_v51 }
  0xf0   : > { %v510_v54 = vpop.f32.mrf.mxu2  ;;  %v827_v56 = vadd.f32 %v1615_v45, %v799_v53 }
  0xf1   : > { %v743_v57 = vpop.f32.mrf.mxu1  ;;  %v296_v61 = vpop.f32.mrf.mxu0  ;;  %v552_v46 = vadd.f32 %v1605_v34, %v510_v54 }
  0xf2   : > { %v835_v59 = vmax.f32 %v827_v56, 0.0  ;;  %v297_v35 = vadd.f32 %v296_v61, %v255_v14  ;;  %v549_v14 = vadd.f32 %v1601_v29, %v507_v50 }
  0xf3   : > { %v784_v62 = vpop.f32.mrf.mxu3  ;;  %v561_v17 = vadd.f32 %v552_v46, %v318_v8 }
  0xf4   : > { %843 = vst [vmem:[%s1622_s25 + $0x18] sm:$0xff] %v835_v59  ;;  %v785_v0 = vadd.f32 %v784_v62, %v743_v57  ;;  %v560_v43 = vadd.f32 %v549_v14, %v315_v40 }
  0xf6   : > { %v800_v1 = vadd.f32 %v785_v0, %v558_v63 }
  0xf8   : > { %v530_v3 = vpop.f32.mrf.mxu2  ;;  %v828_v6 = vadd.f32 %v1615_v45, %v800_v1 }
  0xf9   : > { %v531_v49 = vadd.f32 %v530_v3, %v489_v20  ;;  %v746_v7 = vpop.f32.mrf.mxu1  ;;  %v299_v36 = vpop.f32.mrf.mxu0 }
  0xfa   : > { %v836_v11 = vmax.f32 %v828_v6, 0.0  ;;  %v300_v37 = vadd.f32 %v299_v36, %v1595_v21 }
  0xfb   : > { %v554_v18 = vadd.f32 %v531_v49, %v297_v35  ;;  %v787_v15 = vpop.f32.mrf.mxu3 }
  0xfc   : > { %844 = vst [vmem:[%s1622_s25 + $0x20] sm:$0xff] %v836_v11  ;;  %v788_v31 = vadd.f32 %v787_v15, %v746_v7 }
  0xfd   : > { %v796_v30 = vadd.f32 %v773_v60, %v554_v18 }
  0xfe   : > { %v801_v25 = vadd.f32 %v788_v31, %v559_v28 }
  0xff   : > { %v824_v2 = vadd.f32 %v1615_v45, %v796_v30 }
 0x100   : > { %v533_v9 = vpop.f32.mrf.mxu2  ;;  %v829_v24 = vadd.f32 %v1615_v45, %v801_v25 }
 0x101   : > { %v832_v20 = vmax.f32 %v824_v2, 0.0  ;;  %v534_v38 = vadd.f32 %v533_v9, %v1597_v27  ;;  %v749_v5 = vpop.f32.mrf.mxu1 }
 0x102   : > { %v837_v16 = vmax.f32 %v829_v24, 0.0 }
 0x103   : > { %840 = vst [vmem:[%s1622_s25] sm:$0xff] %v832_v20  ;;  %v555_v42 = vadd.f32 %v534_v38, %v300_v37  ;;  %v790_v29 = vpop.f32.mrf.mxu3 }
 0x104   : > { %845 = vst [vmem:[%s1622_s25 + $0x28] sm:$0xff] %v837_v16  ;;  %v791_v44 = vadd.f32 %v790_v29, %v749_v5 }
 0x105   : > { %v797_v21 = vadd.f32 %v776_v12, %v555_v42 }
 0x106   : > { %v802_v27 = vadd.f32 %v791_v44, %v560_v43 }
 0x107   : > { %v825_v13 = vadd.f32 %v1615_v45, %v797_v21 }
 0x108   : > { %v830_v39 = vadd.f32 %v1615_v45, %v802_v27 }
 0x109   : > { %v833_v50 = vmax.f32 %v825_v13, 0.0  ;;  %v752_v22 = vpop.f32.mrf.mxu1 }
 0x10a   : > { %v838_v41 = vmax.f32 %v830_v39, 0.0 }
 0x10b   : > { %841 = vst [vmem:[%s1622_s25 + $0x8] sm:$0xff] %v833_v50  ;;  %v793_v19 = vpop.f32.mrf.mxu3 }
 0x10c   : > { %846 = vst [vmem:[%s1622_s25 + $0x30] sm:$0xff] %v838_v41  ;;  %v794_v34 = vadd.f32 %v793_v19, %v752_v22 }
 0x10e   : > { %v803_v23 = vadd.f32 %v794_v34, %v561_v17 }
 0x110   : > { %v831_v47 = vadd.f32 %v1615_v45, %v803_v23 }
 0x112   : > { %v839_v33 = vmax.f32 %v831_v47, 0.0 }
 0x114   : > { %847 = vst [vmem:[%s1622_s25 + $0x38] sm:$0xff] %v839_v33 }
 0x115   : > { %1092 = shalt.err (!%p1089_p3)
}
 0x116   : > { %s1129_s4 = smov 128   ;;  %s1130_s20 = smov 8  }
 0x117   : > { %1023 = dma.vmem_to_hbm [thread:$0]  (%p1189_p5), %s863_s5, 1024, %s865_s16, %s849_s6, %s1129_s4, %s1129_s4, %s1130_s20  }
 0x118 PF: > { %p1029_p4 = scmp.ge.s32.totalorder %s1127_s15, 2  ;;  %s879_s24 = sand.u32 1, %s1115_s12  }
 0x119   : > { %s880_s30 = scalar_lea.sflag [#allocation4], %s879_s24 }
 0x11a   : > { %p1026_p7 = pnand %p1029_p4, %p1193_p6 }
 0x11c   : > { %p1027_p8 = pneg %p1026_p7 }
 0x11e   : > { %1110 = dma.done.wait (%p1027_p8), %s880_s30, 1024  }
 0x11f   : > { %1112 = vsyncadd (%p1027_p8), %s880_s30, 4294966272  ;;  %p13_p9 = scmp.ge.s32.totalorder %s1176_s18, 4   ;;  %s1688_s12 = smov %s1119_s13 }
 0x120   : > { %s1689_s13 = smov %s1123_s14  ;;  %s1690_s14 = smov %s1187_s21 }
 0x121   : > { %s1691_s15 = smov %s1176_s18  ;;  %15 = sbr.rel (!%p13_p9) target bundleno = 3 (0x3), region = 69 }
 0x126   :  { %886 = vsyncpa [#allocation4], 1 }
 0x127   :  { %888 = vsyncpa [#allocation4 + $0x1], 1 }

</bundles_post_ra>
